<compile_context>
chip_gen: v7x
topology: tpu7x:2x2x1
jax: 0.10.0
libtpu: 0.0.40
codegen_flags: <defaults>
</compile_context>

<pallas_src>
import functools

import jax
import jax.numpy as jnp
from jax.experimental import pallas as pl
from jax.experimental.pallas import tpu as pltpu


def _round_up(x: int, m: int) -> int:
    return (x + m - 1) // m * m


# ---------------------------------------------------------------------------
# Kernel: one batch tile.
# ---------------------------------------------------------------------------
def mos_kernel(h_ref, w1_ref, b1_ref, wo_ref, bo_ref, out_ref, *,
               n_heads: int, hd_pad: int):
    """
    h_ref  : (TB, H)    hidden tile (native dtype into the MXU, f32 accumulation)
    w1_ref : (H, W1)    fused [Wl_h0 | pad | ... | Wl_h{n-1} | pad | Wp | pad]
    b1_ref : (1, W1)    fused bias (f32)
    wo_ref : (Hp, OUTp) shared, zero-padded output weight
    bo_ref : (1, OUTp)  output bias (f32, -1e30 in padded lanes)
    out_ref: (TB, OUTp)
    """
    lat_w = n_heads * hd_pad
    h = h_ref[...]

    # ---- fused latent + prior projection: one lane-dense matmul ----
    z = jnp.dot(h, w1_ref[...], preferred_element_type=jnp.float32) + b1_ref[...]

    # prior = sigmoid(.), normalized over heads (stable tanh form; tiny -> exact)
    pz = z[:, lat_w:lat_w + n_heads]
    prior = 0.5 * (jnp.tanh(0.5 * pz) + 1.0)
    prior = prior / (jnp.sum(prior, axis=-1, keepdims=True) + 1e-8)

    latent = jnp.tanh(z[:, :lat_w]).astype(wo_ref.dtype)
    wo = wo_ref[...]
    bo = bo_ref[...]  # bias add kept in f32 so the -1e30 padding stays finite

    # ---- per-head: small matmul vs the SHARED Wo + fused softmax/weighting.
    # Exactly the required MXU FLOPs; no (TB, n_heads*OUTp) logits slab.
    acc = jnp.zeros(out_ref.shape, dtype=jnp.float32)
    for head in range(n_heads):                       # small static unroll
        lat_h = latent[:, head * hd_pad:(head + 1) * hd_pad]  # lane-aligned slice
        lg = jnp.dot(lat_h, wo, preferred_element_type=jnp.float32) + bo
        lg = lg - jnp.max(lg, axis=-1, keepdims=True)
        e = jnp.exp(lg)
        # prior weighting folded into the EUP reciprocal -> one (TB, OUTp)
        # VPU multiply per head instead of two.
        scale = prior[:, head:head + 1] * pl.reciprocal(
            jnp.sum(e, axis=-1, keepdims=True), approx=True)
        acc = acc + e * scale
    out_ref[...] = acc.astype(out_ref.dtype)


# ---------------------------------------------------------------------------
# One-time parameter fusion / padding (do this at init time and cache it;
# it must NOT run on every forward step).
# ---------------------------------------------------------------------------
def prepare_mos_params(wp, bp, wl, bl, wo, bo, *, n_heads, hidden_size):
    """wp (H, n_heads), wl (H, n_heads*H), wo (H, out_dim); biases shaped (1, F)."""
    hd_pad = _round_up(hidden_size, 128)
    out_dim = wo.shape[1]
    out_pad = _round_up(out_dim, 128)
    lat_w = n_heads * hd_pad
    w1_w = _round_up(lat_w + n_heads, 128)
    wdt = wo.dtype

    # Fused first-stage weight/bias: per-head latent block padded to 128 lanes,
    # then the prior columns, then lane padding.
    w1 = jnp.zeros((hidden_size, w1_w), wdt)
    b1 = jnp.zeros((1, w1_w), jnp.float32)
    for h in range(n_heads):
        c0 = h * hd_pad
        w1 = w1.at[:, c0:c0 + hidden_size].set(
            wl[:, h * hidden_size:(h + 1) * hidden_size].astype(wdt))
        b1 = b1.at[:, c0:c0 + hidden_size].set(
            bl[:, h * hidden_size:(h + 1) * hidden_size].astype(jnp.float32))
    w1 = w1.at[:, lat_w:lat_w + n_heads].set(wp.astype(wdt))
    b1 = b1.at[:, lat_w:lat_w + n_heads].set(bp.astype(jnp.float32))

    # Shared output weight: zero rows/cols in the padding; bias -1e30 on padded
    # lanes so exp() underflows to 0 under the per-head softmax.
    wo_pad = jnp.zeros((hd_pad, out_pad), wdt).at[:hidden_size, :out_dim].set(wo)
    bo_pad = jnp.full((1, out_pad), -1e30, jnp.float32).at[:, :out_dim].set(
        bo.reshape(1, -1).astype(jnp.float32))

    return dict(w1=w1, b1=b1, wo=wo_pad, bo=bo_pad,
                hd_pad=hd_pad, out_pad=out_pad, out_dim=out_dim, w1_w=w1_w)


# ---------------------------------------------------------------------------
# Forward pass on pre-fused parameters.
# ---------------------------------------------------------------------------
def mos_forward(hidden, params, *, n_heads, hidden_size,
                block_batch=512, out_dtype=jnp.float32):
    """hidden: (..., H).  block_batch guidance: ~256 on v7x (64 MiB VMEM,
    2 TCs), ~1024 on v6e (128 MiB VMEM), 256-512 on v5e."""
    lead = hidden.shape[:-1]
    B = 1
    for d in lead:
        B *= d
    h2 = hidden.reshape(B, hidden_size)

    hd_pad = params["hd_pad"]
    out_pad = params["out_pad"]
    out_dim = params["out_dim"]
    w1_w = params["w1_w"]
    lat_w = n_heads * hd_pad

    # ---- batch tiling: sublane-aligned rows, >= 2 grid steps when possible
    # (so both v7x TensorCores get work), weights VMEM-resident. ----
    row_align = 16 if h2.dtype == jnp.bfloat16 else 8
    tb = min(block_batch, _round_up(B, row_align))
    if B > row_align:                      # ensure grid >= 2 for megacore sharding
        tb = min(tb, _round_up(-(-B // 2), row_align))
    b_pad = _round_up(B, tb)
    if b_pad != B:
        h2 = jnp.pad(h2, ((0, b_pad - B), (0, 0)))
    grid = (b_pad // tb,)

    itemsize_h = h2.dtype.itemsize
    itemsize_w = params["w1"].dtype.itemsize

    # VMEM footprint: double-buffered hidden/out tiles + (double-buffered)
    # resident weights + in-kernel f32 intermediates; generous headroom.
    footprint = (
        2 * tb * hidden_size * itemsize_h
        + 2 * tb * out_pad * 4
        + 2 * (hidden_size * w1_w + hd_pad * out_pad) * itemsize_w
        + 2 * (w1_w + out_pad) * 4
        + tb * (w1_w + lat_w + 3 * out_pad) * 4
    )
    vmem_limit = int(min(60 * 1024 * 1024,
                         max(32 * 1024 * 1024, (footprint * 3) // 2)))

    cost = pl.CostEstimate(
        flops=int(2 * b_pad * hidden_size * w1_w
                  + 2 * b_pad * n_heads * hd_pad * out_pad),
        transcendentals=int(b_pad * (lat_w + n_heads + n_heads * out_pad)),
        bytes_accessed=int(itemsize_h * b_pad * hidden_size
                           + itemsize_w * (hidden_size * w1_w + hd_pad * out_pad)
                           + 4 * (w1_w + out_pad)
                           + jnp.dtype(out_dtype).itemsize * b_pad * out_pad),
    )

    kernel = functools.partial(mos_kernel, n_heads=n_heads, hd_pad=hd_pad)

    out = pl.pallas_call(
        kernel,
        out_shape=jax.ShapeDtypeStruct((b_pad, out_pad), out_dtype),
        grid=grid,
        in_specs=[
            pl.BlockSpec((tb, hidden_size), lambda i: (i, 0)),     # hidden tile
            pl.BlockSpec((hidden_size, w1_w), lambda i: (0, 0)),   # fused W1 (resident)
            pl.BlockSpec((1, w1_w), lambda i: (0, 0)),             # fused b1
            pl.BlockSpec((hd_pad, out_pad), lambda i: (0, 0)),     # shared padded Wo
            pl.BlockSpec((1, out_pad), lambda i: (0, 0)),          # padded bo
        ],
        out_specs=pl.BlockSpec((tb, out_pad), lambda i: (i, 0)),
        compiler_params=pltpu.CompilerParams(
            dimension_semantics=("parallel",),
            vmem_limit_bytes=vmem_limit),
        cost_estimate=cost,
    )(h2, params["w1"], params["b1"], params["wo"], params["bo"])

    return out[:B, :out_dim].reshape(*lead, out_dim)


def mixture_of_softmaxes(hidden, wp, bp, wl, bl, wo, bo, *,
                         n_heads, hidden_size, block_batch=512):
    """Convenience wrapper.  In a real model, call prepare_mos_params() ONCE
    (at init) and reuse the fused params across steps; this wrapper refuses it
    only for self-contained testing."""
    params = prepare_mos_params(wp, bp, wl, bl, wo, bo,
                                n_heads=n_heads, hidden_size=hidden_size)
    return mos_forward(hidden, params, n_heads=n_heads,
                       hidden_size=hidden_size, block_batch=block_batch)


def reference(hidden, wp, bp, wl, bl, wo, bo, *, n_heads, hidden_size):
    """Pure-JAX mirror of the PyTorch forward, for correctness checking."""
    prior = jax.nn.sigmoid(hidden @ wp + bp[0])
    prior = prior / (prior.sum(-1, keepdims=True) + 1e-8)
    latent = jnp.tanh(hidden @ wl + bl[0])
    latent = latent.reshape(*hidden.shape[:-1], n_heads, hidden_size)
    logits = latent @ wo + bo[0]
    sm = jax.nn.softmax(logits, axis=-1)
    return (prior[..., None] * sm).sum(-2)


if __name__ == "__main__":
    # Synthetic deterministic setup (no dataset / checkpoints).
    B = 8               # batch
    H = 32              # args.hidden_size
    N_HEADS = 4         # args.n_mixture_components
    OUT_DIM = 10        # len(vocab) + 1

    key = jax.random.PRNGKey(0)
    k_h, k_wp, k_bp, k_wl, k_bl, k_wo, k_bo = jax.random.split(key, 7)

    bound = 1.0 / jnp.sqrt(H)  # mimic nn.Linear default uniform init
    hidden = jax.random.normal(k_h, (B, H), dtype=jnp.float32)
    wp = jax.random.uniform(k_wp, (H, N_HEADS), jnp.float32, -bound, bound)
    bp = jax.random.uniform(k_bp, (1, N_HEADS), jnp.float32, -bound, bound)
    wl = jax.random.uniform(k_wl, (H, N_HEADS * H), jnp.float32, -bound, bound)
    bl = jax.random.uniform(k_bl, (1, N_HEADS * H), jnp.float32, -bound, bound)
    wo = jax.random.uniform(k_wo, (H, OUT_DIM), jnp.float32, -bound, bound)
    # `initialize=True` path sets output.bias to log label frequencies:
    label_freqs = jax.random.uniform(k_bo, (OUT_DIM,), jnp.float32, 0.01, 1.0)
    label_freqs = label_freqs / label_freqs.sum()
    bo = jnp.log(label_freqs)[None, :]

    # One-time parameter fusion (cache this in real use), then the kernel.
    params = prepare_mos_params(wp, bp, wl, bl, wo, bo,
                                n_heads=N_HEADS, hidden_size=H)
    out = mos_forward(hidden, params, n_heads=N_HEADS, hidden_size=H)
    out = jax.block_until_ready(out)

    ref = reference(hidden, wp, bp, wl, bl, wo, bo, n_heads=N_HEADS, hidden_size=H)
    assert out.shape == (B, OUT_DIM)
    # Slightly loosened tolerance: softmax denominators use the EUP approximate
    # reciprocal (pl.reciprocal(approx=True)) — document for downstream use.
    assert jnp.allclose(out, ref, atol=1e-3, rtol=1e-3), "mismatch vs JAX reference"

    print("KERNEL_OK")
</pallas_src>

<mosaic_0001>
module attributes {stable_mosaic.version = 11 : i64} {
  func.func @mos_kernel(%arg0: i32, %arg1: memref<8x32xf32, #tpu.memory_space<vmem>>, %arg2: memref<32x640xf32, #tpu.memory_space<vmem>>, %arg3: memref<1x640xf32, #tpu.memory_space<vmem>>, %arg4: memref<128x128xf32, #tpu.memory_space<vmem>>, %arg5: memref<1x128xf32, #tpu.memory_space<vmem>>, %arg6: memref<8x128xf32, #tpu.memory_space<vmem>>) attributes {dimension_semantics = [#tpu.dimension_semantics<parallel>], iteration_bounds = array<i64: 1>, scalar_prefetch = 0 : i64, scratch_operands = 0 : i64, tpu.core_type = #tpu.core_type<tc>, window_params = [{transform_indices = @transform_0, window_bounds = array<i64: 8, 32>}, {pipeline_mode = #tpu.pipeline_mode<synchronous>, transform_indices = @transform_1, window_bounds = array<i64: 32, 640>}, {pipeline_mode = #tpu.pipeline_mode<synchronous>, transform_indices = @transform_2, window_bounds = array<i64: 1, 640>}, {pipeline_mode = #tpu.pipeline_mode<synchronous>, transform_indices = @transform_3, window_bounds = array<i64: 128, 128>}, {pipeline_mode = #tpu.pipeline_mode<synchronous>, transform_indices = @transform_4, window_bounds = array<i64: 1, 128>}, {transform_indices = @transform_5, window_bounds = array<i64: 8, 128>}]} {
    %c0 = arith.constant 0 : index
    %c0_0 = arith.constant 0 : index
    %0 = vector.load %arg1[%c0, %c0_0] : memref<8x32xf32, #tpu.memory_space<vmem>>, vector<8x32xf32>
    %c0_1 = arith.constant 0 : index
    %c0_2 = arith.constant 0 : index
    %1 = vector.load %arg2[%c0_1, %c0_2] : memref<32x640xf32, #tpu.memory_space<vmem>>, vector<32x640xf32>
    %cst = arith.constant dense<0.000000e+00> : vector<8x640xf32>
    %2 = tpu.matmul %0, %1, %cst {dimension_numbers = #tpu.dot_dimension_numbers<[1], [0], [0], [1], [0, 0, 1, 1], [], []>} : vector<8x32xf32>, vector<32x640xf32>, vector<8x640xf32> -> vector<8x640xf32>
    %c0_3 = arith.constant 0 : index
    %c0_4 = arith.constant 0 : index
    %3 = vector.load %arg3[%c0_3, %c0_4] : memref<1x640xf32, #tpu.memory_space<vmem>>, vector<1x640xf32>
    %4 = vector.broadcast %3 : vector<1x640xf32> to vector<8x640xf32>
    %5 = arith.addf %2, %4 : vector<8x640xf32>
    %6 = vector.extract_strided_slice %5 {offsets = [0, 512], sizes = [8, 4], strides = [1, 1]} : vector<8x640xf32> to vector<8x4xf32>
    %cst_5 = arith.constant 5.000000e-01 : f32
    %7 = vector.broadcast %cst_5 : f32 to vector<8x4xf32>
    %8 = arith.mulf %7, %6 : vector<8x4xf32>
    %9 = math.tanh %8 : vector<8x4xf32>
    %cst_6 = arith.constant 1.000000e+00 : f32
    %10 = vector.broadcast %cst_6 : f32 to vector<8x4xf32>
    %11 = arith.addf %9, %10 : vector<8x4xf32>
    %cst_7 = arith.constant 5.000000e-01 : f32
    %12 = vector.broadcast %cst_7 : f32 to vector<8x4xf32>
    %13 = arith.mulf %12, %11 : vector<8x4xf32>
    %cst_8 = arith.constant dense<0.000000e+00> : vector<8xf32>
    %14 = vector.multi_reduction <add>, %13, %cst_8 [1] : vector<8x4xf32> to vector<8xf32>
    %15 = vector.shape_cast %14 : vector<8xf32> to vector<8x1xf32>
    %cst_9 = arith.constant 9.99999993E-9 : f32
    %16 = vector.broadcast %cst_9 : f32 to vector<8x1xf32>
    %17 = arith.addf %15, %16 : vector<8x1xf32>
    %18 = vector.broadcast %17 : vector<8x1xf32> to vector<8x4xf32>
    %19 = arith.divf %13, %18 : vector<8x4xf32>
    %20 = vector.extract_strided_slice %5 {offsets = [0, 0], sizes = [8, 512], strides = [1, 1]} : vector<8x640xf32> to vector<8x512xf32>
    %21 = math.tanh %20 : vector<8x512xf32>
    %c0_10 = arith.constant 0 : index
    %c0_11 = arith.constant 0 : index
    %22 = vector.load %arg4[%c0_10, %c0_11] : memref<128x128xf32, #tpu.memory_space<vmem>>, vector<128x128xf32>
    %c0_12 = arith.constant 0 : index
    %c0_13 = arith.constant 0 : index
    %23 = vector.load %arg5[%c0_12, %c0_13] : memref<1x128xf32, #tpu.memory_space<vmem>>, vector<1x128xf32>
    %cst_14 = arith.constant 0.000000e+00 : f32
    %24 = vector.broadcast %cst_14 : f32 to vector<8x128xf32>
    %25 = vector.extract_strided_slice %21 {offsets = [0, 0], sizes = [8, 128], strides = [1, 1]} : vector<8x512xf32> to vector<8x128xf32>
    %cst_15 = arith.constant dense<0.000000e+00> : vector<8x128xf32>
    %26 = tpu.matmul %25, %22, %cst_15 {dimension_numbers = #tpu.dot_dimension_numbers<[1], [0], [0], [1], [0, 0, 1, 1], [], []>} : vector<8x128xf32>, vector<128x128xf32>, vector<8x128xf32> -> vector<8x128xf32>
    %27 = vector.broadcast %23 : vector<1x128xf32> to vector<8x128xf32>
    %28 = arith.addf %26, %27 : vector<8x128xf32>
    %cst_16 = arith.constant dense<0xFF800000> : vector<8xf32>
    %29 = vector.multi_reduction <maximumf>, %28, %cst_16 [1] : vector<8x128xf32> to vector<8xf32>
    %30 = vector.shape_cast %29 : vector<8xf32> to vector<8x1xf32>
    %31 = vector.broadcast %30 : vector<8x1xf32> to vector<8x128xf32>
    %32 = arith.subf %28, %31 : vector<8x128xf32>
    %33 = math.exp %32 : vector<8x128xf32>
    %34 = vector.extract_strided_slice %19 {offsets = [0, 0], sizes = [8, 1], strides = [1, 1]} : vector<8x4xf32> to vector<8x1xf32>
    %cst_17 = arith.constant dense<0.000000e+00> : vector<8xf32>
    %35 = vector.multi_reduction <add>, %33, %cst_17 [1] : vector<8x128xf32> to vector<8xf32>
    %36 = vector.shape_cast %35 : vector<8xf32> to vector<8x1xf32>
    %37 = tpu.reciprocal %36 {approx = true} : vector<8x1xf32> -> vector<8x1xf32>
    %38 = arith.mulf %34, %37 : vector<8x1xf32>
    %39 = vector.broadcast %38 : vector<8x1xf32> to vector<8x128xf32>
    %40 = arith.mulf %33, %39 : vector<8x128xf32>
    %41 = arith.addf %24, %40 : vector<8x128xf32>
    %42 = vector.extract_strided_slice %21 {offsets = [0, 128], sizes = [8, 128], strides = [1, 1]} : vector<8x512xf32> to vector<8x128xf32>
    %cst_18 = arith.constant dense<0.000000e+00> : vector<8x128xf32>
    %43 = tpu.matmul %42, %22, %cst_18 {dimension_numbers = #tpu.dot_dimension_numbers<[1], [0], [0], [1], [0, 0, 1, 1], [], []>} : vector<8x128xf32>, vector<128x128xf32>, vector<8x128xf32> -> vector<8x128xf32>
    %44 = vector.broadcast %23 : vector<1x128xf32> to vector<8x128xf32>
    %45 = arith.addf %43, %44 : vector<8x128xf32>
    %cst_19 = arith.constant dense<0xFF800000> : vector<8xf32>
    %46 = vector.multi_reduction <maximumf>, %45, %cst_19 [1] : vector<8x128xf32> to vector<8xf32>
    %47 = vector.shape_cast %46 : vector<8xf32> to vector<8x1xf32>
    %48 = vector.broadcast %47 : vector<8x1xf32> to vector<8x128xf32>
    %49 = arith.subf %45, %48 : vector<8x128xf32>
    %50 = math.exp %49 : vector<8x128xf32>
    %51 = vector.extract_strided_slice %19 {offsets = [0, 1], sizes = [8, 1], strides = [1, 1]} : vector<8x4xf32> to vector<8x1xf32>
    %cst_20 = arith.constant dense<0.000000e+00> : vector<8xf32>
    %52 = vector.multi_reduction <add>, %50, %cst_20 [1] : vector<8x128xf32> to vector<8xf32>
    %53 = vector.shape_cast %52 : vector<8xf32> to vector<8x1xf32>
    %54 = tpu.reciprocal %53 {approx = true} : vector<8x1xf32> -> vector<8x1xf32>
    %55 = arith.mulf %51, %54 : vector<8x1xf32>
    %56 = vector.broadcast %55 : vector<8x1xf32> to vector<8x128xf32>
    %57 = arith.mulf %50, %56 : vector<8x128xf32>
    %58 = arith.addf %41, %57 : vector<8x128xf32>
    %59 = vector.extract_strided_slice %21 {offsets = [0, 256], sizes = [8, 128], strides = [1, 1]} : vector<8x512xf32> to vector<8x128xf32>
    %cst_21 = arith.constant dense<0.000000e+00> : vector<8x128xf32>
    %60 = tpu.matmul %59, %22, %cst_21 {dimension_numbers = #tpu.dot_dimension_numbers<[1], [0], [0], [1], [0, 0, 1, 1], [], []>} : vector<8x128xf32>, vector<128x128xf32>, vector<8x128xf32> -> vector<8x128xf32>
    %61 = vector.broadcast %23 : vector<1x128xf32> to vector<8x128xf32>
    %62 = arith.addf %60, %61 : vector<8x128xf32>
    %cst_22 = arith.constant dense<0xFF800000> : vector<8xf32>
    %63 = vector.multi_reduction <maximumf>, %62, %cst_22 [1] : vector<8x128xf32> to vector<8xf32>
    %64 = vector.shape_cast %63 : vector<8xf32> to vector<8x1xf32>
    %65 = vector.broadcast %64 : vector<8x1xf32> to vector<8x128xf32>
    %66 = arith.subf %62, %65 : vector<8x128xf32>
    %67 = math.exp %66 : vector<8x128xf32>
    %68 = vector.extract_strided_slice %19 {offsets = [0, 2], sizes = [8, 1], strides = [1, 1]} : vector<8x4xf32> to vector<8x1xf32>
    %cst_23 = arith.constant dense<0.000000e+00> : vector<8xf32>
    %69 = vector.multi_reduction <add>, %67, %cst_23 [1] : vector<8x128xf32> to vector<8xf32>
    %70 = vector.shape_cast %69 : vector<8xf32> to vector<8x1xf32>
    %71 = tpu.reciprocal %70 {approx = true} : vector<8x1xf32> -> vector<8x1xf32>
    %72 = arith.mulf %68, %71 : vector<8x1xf32>
    %73 = vector.broadcast %72 : vector<8x1xf32> to vector<8x128xf32>
    %74 = arith.mulf %67, %73 : vector<8x128xf32>
    %75 = arith.addf %58, %74 : vector<8x128xf32>
    %76 = vector.extract_strided_slice %21 {offsets = [0, 384], sizes = [8, 128], strides = [1, 1]} : vector<8x512xf32> to vector<8x128xf32>
    %cst_24 = arith.constant dense<0.000000e+00> : vector<8x128xf32>
    %77 = tpu.matmul %76, %22, %cst_24 {dimension_numbers = #tpu.dot_dimension_numbers<[1], [0], [0], [1], [0, 0, 1, 1], [], []>} : vector<8x128xf32>, vector<128x128xf32>, vector<8x128xf32> -> vector<8x128xf32>
    %78 = vector.broadcast %23 : vector<1x128xf32> to vector<8x128xf32>
    %79 = arith.addf %77, %78 : vector<8x128xf32>
    %cst_25 = arith.constant dense<0xFF800000> : vector<8xf32>
    %80 = vector.multi_reduction <maximumf>, %79, %cst_25 [1] : vector<8x128xf32> to vector<8xf32>
    %81 = vector.shape_cast %80 : vector<8xf32> to vector<8x1xf32>
    %82 = vector.broadcast %81 : vector<8x1xf32> to vector<8x128xf32>
    %83 = arith.subf %79, %82 : vector<8x128xf32>
    %84 = math.exp %83 : vector<8x128xf32>
    %85 = vector.extract_strided_slice %19 {offsets = [0, 3], sizes = [8, 1], strides = [1, 1]} : vector<8x4xf32> to vector<8x1xf32>
    %cst_26 = arith.constant dense<0.000000e+00> : vector<8xf32>
    %86 = vector.multi_reduction <add>, %84, %cst_26 [1] : vector<8x128xf32> to vector<8xf32>
    %87 = vector.shape_cast %86 : vector<8xf32> to vector<8x1xf32>
    %88 = tpu.reciprocal %87 {approx = true} : vector<8x1xf32> -> vector<8x1xf32>
    %89 = arith.mulf %85, %88 : vector<8x1xf32>
    %90 = vector.broadcast %89 : vector<8x1xf32> to vector<8x128xf32>
    %91 = arith.mulf %84, %90 : vector<8x128xf32>
    %92 = arith.addf %75, %91 : vector<8x128xf32>
    %c0_27 = arith.constant 0 : index
    %c0_28 = arith.constant 0 : index
    %93 = vector.load %arg6[%c0_27, %c0_28] : memref<8x128xf32, #tpu.memory_space<vmem>>, vector<8x128xf32>
    tpu.vector_store %arg6[%c0_27, %c0_28], %92 {strides = array<i32>} : memref<8x128xf32, #tpu.memory_space<vmem>>, vector<8x128xf32>,
    return
  }
  func.func @transform_0(%arg0: i32) -> (i32, i32) {
    %c0_i32 = arith.constant 0 : i32
    %c0_i32_0 = arith.constant 0 : i32
    return %arg0, %c0_i32 : i32, i32
  }
  func.func @transform_1(%arg0: i32) -> (i32, i32) {
    %c0_i32 = arith.constant 0 : i32
    %c0_i32_0 = arith.constant 0 : i32
    %c0_i32_1 = arith.constant 0 : i32
    return %c0_i32, %c0_i32_0 : i32, i32
  }
  func.func @transform_2(%arg0: i32) -> (i32, i32) {
    %c0_i32 = arith.constant 0 : i32
    %c0_i32_0 = arith.constant 0 : i32
    %c0_i32_1 = arith.constant 0 : i32
    return %c0_i32, %c0_i32_0 : i32, i32
  }
  func.func @transform_3(%arg0: i32) -> (i32, i32) {
    %c0_i32 = arith.constant 0 : i32
    %c0_i32_0 = arith.constant 0 : i32
    %c0_i32_1 = arith.constant 0 : i32
    return %c0_i32, %c0_i32_0 : i32, i32
  }
  func.func @transform_4(%arg0: i32) -> (i32, i32) {
    %c0_i32 = arith.constant 0 : i32
    %c0_i32_0 = arith.constant 0 : i32
    %c0_i32_1 = arith.constant 0 : i32
    return %c0_i32, %c0_i32_0 : i32, i32
  }
  func.func @transform_5(%arg0: i32) -> (i32, i32) {
    %c0_i32 = arith.constant 0 : i32
    %c0_i32_0 = arith.constant 0 : i32
    return %arg0, %c0_i32 : i32, i32
  }
}

</mosaic_0001>

<bundles_post_ra>
// kernel: tpu_custom_call.1
= control target key start
LH: loop header
LB: loop body
LE: loop exit
PB: predicated region body
PF: predicated region fallthrough
CT: control target
= control target key end

     0   :  { %10 = vsyncpa [#allocation3], 0  ;;  %s1421_s0 = inlined_call_operand.hbm [shape: f32[8,32], index: 0, kind: input, shape index: {}]   ;;  %s1422_s1 = inlined_call_operand.hbm [shape: f32[32,640], index: 1, kind: input, shape index: {}]   ;;  %s1423_s2 = inlined_call_operand.vmem [shape: f32[1,640], index: 2, kind: input, shape index: {}]   ;;  %s1424_s3 = inlined_call_operand.hbm [shape: f32[128,128], index: 3, kind: input, shape index: {}]   ;;  %s1425_s4 = inlined_call_operand.vmem [shape: f32[1,128], index: 4, kind: input, shape index: {}]   ;;  %s1426_s5 = inlined_call_operand.hbm [shape: f32[8,128], index: 5, kind: output, shape index: {}]  }
   0x1   :  { %11 = vsyncpa [#allocation6], 0 }
   0x2   :  { %12 = vsyncpa [#allocation4], 0  ;;  %s1211_s18 = smov [#allocation5]   ;;  %s1117_s22 = scalar_lea.hbm %s1422_s1, 2560 }
   0x3   :  { %s28_s19 = sshll.u32 %s1211_s18, 4  ;;  %p1118_p0 = scmp.ne.s32.totalorder %s1422_s1, %s1117_s22  ;;  %s29_s19 = int_to_ptr.vmem [resolvable:$true] %s28_s19 }
   0x4   :  { %p1121_p1 = scmp.lt.u32.totalorder %s1117_s22, %s1422_s1 }
   0x6   :  { %p1123_p2 = pnand %p1121_p1, %p1118_p0 }
   0x8   :  { %1126 = shalt.err (!%p1123_p2)
}
   0x9   :  { %s1127_s27 = scalar_lea.vmem %s29_s19, 2560  ;;  %p1132_p4 = scmp.lt.s32.totalorder %s29_s19, %s29_s19 }
   0xa   :  { %p1128_p3 = scmp.ne.s32.totalorder %s29_s19, %s1127_s27  ;;  %p1133_p5 = scmp.lt.s32.totalorder %s1127_s27, %s1127_s27 }
   0xc   :  { %p1134_p6 = por %p1133_p5, %p1132_p4 }
   0xe   :  { %p1135_p7 = pnand %p1134_p6, %p1128_p3 }
  0x10   :  { %1138 = shalt.err (!%p1135_p7)
}
  0x11   :  { %s1212_s28 = smov 640   ;;  %s1213_s29 = smov 40  }
  0x12   :  { %34 = dma.hbm_to_vmem [thread:$0]  %s1422_s1, 2560, %s29_s19, [#allocation6], %s1212_s28, %s1212_s28, %s1213_s29  }
  0x13   :  { %s1214_s7 = smov [#allocation2]   ;;  %s1215_s9 = smov [#allocation7]  }
  0x14   :  { %s19_s8 = sshll.u32 %s1214_s7, 4  ;;  %s42_s10 = sshll.u32 %s1215_s9, 4  ;;  %s20_s8 = int_to_ptr.vmem [resolvable:$true] %s19_s8  ;;  %s43_s10 = int_to_ptr.vmem [resolvable:$true] %s42_s10 }
  0x15   :  { %s1139_s13 = scalar_lea.hbm %s1421_s0, 128 }
  0x16   :  { %p1140_p8 = scmp.ne.s32.totalorder %s1421_s0, %s1139_s13  ;;  %p1143_p9 = scmp.lt.u32.totalorder %s1139_s13, %s1421_s0 }
  0x18   :  { %p1145_p10 = pnand %p1143_p9, %p1140_p8 }
  0x1a   :  { %1148 = shalt.err (!%p1145_p10)
}
  0x1b   :  { %s1149_s1 = scalar_lea.vmem %s20_s8, 128  ;;  %p1154_p12 = scmp.lt.s32.totalorder %s20_s8, %s20_s8 }
  0x1c   :  { %p1150_p11 = scmp.ne.s32.totalorder %s20_s8, %s1149_s1  ;;  %p1155_p13 = scmp.lt.s32.totalorder %s1149_s1, %s1149_s1 }
  0x1e   :  { %p1156_p0 = por %p1155_p13, %p1154_p12 }
  0x20   :  { %p1157_p1 = pnand %p1156_p0, %p1150_p11 }
  0x22   :  { %1160 = shalt.err (!%p1157_p1)
}
  0x23   :  { %22 = dma.hbm_to_vmem [thread:$0]  %s1421_s0, 128, %s20_s8, [#allocation3]  }
  0x24   :  { %s1161_s22 = scalar_lea.hbm %s1424_s3, 2048 }
  0x25   :  { %p1162_p2 = scmp.ne.s32.totalorder %s1424_s3, %s1161_s22  ;;  %p1165_p3 = scmp.lt.u32.totalorder %s1161_s22, %s1424_s3 }
  0x27   :  { %p1167_p4 = pnand %p1165_p3, %p1162_p2 }
  0x29   :  { %1170 = shalt.err (!%p1167_p4)
}
  0x2a   :  { %s1171_s27 = scalar_lea.vmem %s43_s10, 2048  ;;  %p1176_p6 = scmp.lt.s32.totalorder %s43_s10, %s43_s10 }
  0x2b   :  { %p1172_p5 = scmp.ne.s32.totalorder %s43_s10, %s1171_s27  ;;  %p1177_p7 = scmp.lt.s32.totalorder %s1171_s27, %s1171_s27 }
  0x2d   :  { %p1178_p8 = por %p1177_p7, %p1176_p6 }
  0x2f   :  { %p1179_p9 = pnand %p1178_p8, %p1172_p5 }
  0x31   :  { %1182 = shalt.err (!%p1179_p9)
}
  0x32   :  { %s1216_s0 = smov 128   ;;  %s1217_s28 = smov 8  }
  0x33   :  { %48 = dma.hbm_to_vmem [thread:$0]  %s1424_s3, 2048, %s43_s10, [#allocation6], %s1216_s0, %s1216_s0, %s1217_s28  }
  0x34   :  { %1205 = dma.done.wait [#allocation3], 128  }
  0x35   :  { %1206 = vsyncadd [#allocation3], 4294967168 }
  0x36   :  { %1207 = dma.done.wait [#allocation6], 4608  }
  0x37   :  { %1208 = vsyncadd [#allocation6], 4294962688  ;;  %v1218_v0 = vmov 0.0   ;;  %v62_v1 = vld [vmem:[#allocation5 + $0x8] sm:$0xff]  ;;  %v67_v2 = vld [vmem:[#allocation5 + $0x30] sm:$0xff]  ;;  %vm108_vm0 = vcmask 261120   ;;  %v83_v57 = vlaneseq }
  0x38   :  { %176 = vmatprep.mubr.f32.mxu0 %v1218_v0  ;;  %247 = vmatprep.mubr.f32.mxu1 %v1218_v0  ;;  %v61_v3 = vld [vmem:[#allocation5] sm:$0xff]  ;;  %v951_v4 = vpack.c.bf16 %v67_v2, %v62_v1  ;;  %v66_v5 = vld [vmem:[#allocation5 + $0x28] sm:$0xff]  ;;  %v72_v6 = vld [vmem:[#allocation5 + $0x58] sm:$0xff]  ;;  %v1219_v31 = vmov 0.0|0.0   ;;  %vm1220_vm1 = vmmov 0   ;;  %vm328_vm2 = vcmask 31744  }
  0x39   :  { %v77_v7 = vld [vmem:[#allocation5 + $0x80] sm:$0xff]  ;;  %v953_v8 = vpack.c.bf16 %v66_v5, %v61_v3  ;;  %v71_v10 = vld [vmem:[#allocation5 + $0x50] sm:$0xff]  ;;  %v76_v11 = vld [vmem:[#allocation5 + $0x78] sm:$0xff]  ;;  %v1355_v58 = vshrl.u32 %v83_v57, 7 }
  0x3a   :  { %v955_v9 = vpack.c.bf16 %v77_v7, %v72_v6  ;;  %952 = vmatprep.subr.bf16.mxu0 %v951_v4  ;;  %v64_v12 = vld [vmem:[#allocation5 + $0x18] sm:$0xff]  ;;  %v69_v13 = vld [vmem:[#allocation5 + $0x40] sm:$0xff]  ;;  %v63_v14 = vld [vmem:[#allocation5 + $0x10] sm:$0xff]  ;;  %v957_v15 = vpack.c.bf16 %v76_v11, %v71_v10 }
  0x3b   :  { %954 = vmatpush1.bf16.msra.mxu0 %v953_v8  ;;  %v959_v16 = vpack.c.bf16 %v69_v13, %v64_v12  ;;  %v68_v17 = vld [vmem:[#allocation5 + $0x38] sm:$0xff]  ;;  %v74_v18 = vld [vmem:[#allocation5 + $0x68] sm:$0xff]  ;;  %v79_v19 = vld [vmem:[#allocation5 + $0x90] sm:$0xff]  ;;  %v85_v59 = vsub.s32 0, %v1355_v58  ;;  %v89_v61 = vsub.s32 1, %v1355_v58  ;;  %v93_v11 = vsub.s32 2, %v1355_v58 }
  0x3c   :  { %956 = vmatprep.subr.bf16.mxu0 %v955_v9  ;;  %v961_v20 = vpack.c.bf16 %v68_v17, %v63_v14  ;;  %v963_v21 = vpack.c.bf16 %v79_v19, %v74_v18  ;;  %v73_v22 = vld [vmem:[#allocation5 + $0x60] sm:$0xff]  ;;  %v78_v23 = vld [vmem:[#allocation5 + $0x88] sm:$0xff]  ;;  %v60_v27 = vld [vmem:[#allocation2] sm:$0xff]  ;;  %v97_v12 = vsub.s32 3, %v1355_v58  ;;  %v101_v18 = vsub.s32 4, %v1355_v58 }
  0x3d   :  { %v65_v24 = vld [vmem:[#allocation5 + $0x20] sm:$0xff]  ;;  %960 = vmatprep.subr.bf16.mxu1 %v959_v16  ;;  %v70_v25 = vld [vmem:[#allocation5 + $0x48] sm:$0xff]  ;;  %v965_v26 = vpack.c.bf16 %v78_v23, %v73_v22  ;;  %v75_v32 = vld [vmem:[#allocation5 + $0x70] sm:$0xff] }
  0x3e   :  { %962 = vmatpush1.bf16.msra.mxu1 %v961_v20  ;;  %v968_v28 = vpack.c.bf16 %v70_v25, %v65_v24  ;;  %v339_v29 = vld [vmem:[#allocation7] sm:$0xff]  ;;  %v340_v30 = vld [vmem:[#allocation7 + $0x8] sm:$0xff]  ;;  %v80_v33 = vld [vmem:[#allocation5 + $0x98] sm:$0xff] }
  0x3f   :  { %958 = vmatpush1.bf16.msra.mxu0 %v957_v15  ;;  %964 = vmatprep.subr.bf16.mxu1 %v963_v21  ;;  %v1296_v34 = vpack.c.bf16 %v340_v30, %v339_v29  ;;  %v971_v35 = vpack.c.bf16 %v80_v33, %v75_v32  ;;  %v341_v36 = vld [vmem:[#allocation7 + $0x10] sm:$0xff]  ;;  %v342_v37 = vld [vmem:[#allocation7 + $0x18] sm:$0xff]  ;;  %v343_v39 = vld [vmem:[#allocation7 + $0x20] sm:$0xff] }
  0x40   :  { %967 = vmatprep.subr.bf16.mxu0 %v1219_v31  ;;  %v1304_v38 = vpack.c.bf16 %v342_v37, %v341_v36  ;;  %v344_v40 = vld [vmem:[#allocation7 + $0x28] sm:$0xff]  ;;  %v345_v42 = vld [vmem:[#allocation7 + $0x30] sm:$0xff]  ;;  %v346_v43 = vld [vmem:[#allocation7 + $0x38] sm:$0xff] }
  0x41   :  { %v1312_v41 = vpack.c.bf16 %v344_v40, %v343_v39  ;;  %v1320_v44 = vpack.c.bf16 %v346_v43, %v345_v42  ;;  %v347_v45 = vld [vmem:[#allocation7 + $0x40] sm:$0xff]  ;;  %v348_v46 = vld [vmem:[#allocation7 + $0x48] sm:$0xff]  ;;  %v349_v48 = vld [vmem:[#allocation7 + $0x50] sm:$0xff] }
  0x42   :  { %723 = vmatmul.mubr.msk.f32.vlgmr.msra.gmra.mrb[0].mxu0 %vm108_vm0, %v60_v27  ;;  %966 = vmatpush1.bf16.msra.mxu1 %v965_v26  ;;  %v1326_v47 = vpack.c.bf16 %v348_v46, %v347_v45  ;;  %v350_v49 = vld [vmem:[#allocation7 + $0x58] sm:$0xff]  ;;  %v351_v51 = vld [vmem:[#allocation7 + $0x60] sm:$0xff]  ;;  %v352_v52 = vld [vmem:[#allocation7 + $0x68] sm:$0xff] }
  0x43   :  { %969 = vmatpush3.bf16.msra.mxu0 %v968_v28  ;;  %973 = vmatprep.subr.bf16.mxu1 %v1219_v31  ;;  %v1337_v50 = vpack.c.bf16 %v350_v49, %v349_v48  ;;  %v1343_v53 = vpack.c.bf16 %v352_v52, %v351_v51  ;;  %v353_v54 = vld [vmem:[#allocation7 + $0x70] sm:$0xff]  ;;  %v354_v55 = vld [vmem:[#allocation7 + $0x78] sm:$0xff] }
  0x44   :  { %970 = vmatprep.subr.bf16.mxu0 %v1219_v31  ;;  %808 = vmatprep.mubr.msk.f32.mxu0 %vm1220_vm1, %v1218_v0  ;;  %v1347_v56 = vpack.c.bf16 %v354_v55, %v353_v54  ;;  %v1361_v60 = vld [vmem:[%s1423_s2] sm:$0x1f]  ;;  %v1222_v54 = vmov 1  }
  0x45   :  { %724 = vmatmul.mubr.msk.f32.vlgmr.msra.gmra.mrb[0].mxu1 %vm108_vm0, %v60_v27  ;;  %v86_v62 = vrot.slane %v1361_v60, %v85_v59  ;;  %v90_v63 = vrot.slane %v1361_v60, %v89_v61  ;;  %v98_v13 = vrot.slane %v1361_v60, %v97_v12  ;;  %v102_v19 = vrot.slane %v1361_v60, %v101_v18  ;;  %v726_v22 = vld [vmem:[%s1425_s4] ss:$0 sm:$0xff]  ;;  %s1225_s4 = smov [#allocation8]  }
  0x46   :  { %975 = vmatpush3.bf16.msra.mxu1 %v1296_v34  ;;  %843 = vmatprep.mubr.msk.f32.mxu1 %vm1220_vm1, %v1218_v0  ;;  %s713_s8 = sshll.u32 %s1225_s4, 4  ;;  %s714_s8 = int_to_ptr.vmem [resolvable:$true] %s713_s8 }
  0x47   :  { %972 = vmatpush3.bf16.msra.mxu0 %v971_v35  ;;  %976 = vmatprep.subr.bf16.mxu1 %v1219_v31  ;;  %s1183_s9 = scalar_lea.vmem %s714_s8, 128  ;;  %p1188_p11 = scmp.lt.s32.totalorder %s714_s8, %s714_s8 }
  0x48   :  { %997 = vmatprep.subr.bf16.mxu0 %v1219_v31  ;;  %1085 = vset.pattern.permute.xlu0 %v1222_v54  ;;  %p1184_p10 = scmp.ne.s32.totalorder %s714_s8, %s1183_s9  ;;  %p1189_p12 = scmp.lt.s32.totalorder %s1183_s9, %s1183_s9 }
  0x4a   :  { %809 = vmatmul.mubr.msk.f32.vlgmr.msra.gmra.mrb[2].mxu0 %vm108_vm0, %v60_v27  ;;  %978 = vmatpush3.bf16.msra.mxu1 %v1304_v38  ;;  %p1190_p13 = por %p1189_p12, %p1188_p11 }
  0x4b   :  { %999 = vmatpush3.bf16.msra.mxu0 %v1296_v34  ;;  %979 = vmatprep.subr.bf16.mxu1 %v1219_v31 }
  0x4c   :  { %1000 = vmatprep.subr.bf16.mxu0 %v1219_v31  ;;  %878 = vmatprep.mubr.msk.f32.mxu0 %vm1220_vm1, %v1218_v0  ;;  %p1191_p0 = pnand %p1190_p13, %p1184_p10 }
  0x4e   :  { %981 = vmatpush3.bf16.msra.mxu1 %v1312_v41 }
  0x4f   :  { %1002 = vmatpush3.bf16.msra.mxu0 %v1304_v38  ;;  %982 = vmatprep.subr.bf16.mxu1 %v1219_v31 }
  0x50   :  { %1003 = vmatprep.subr.bf16.mxu0 %v1219_v31 }
  0x52   :  { %984 = vmatpush3.bf16.msra.mxu1 %v1320_v44 }
  0x53   :  { %1005 = vmatpush3.bf16.msra.mxu0 %v1312_v41  ;;  %985 = vmatprep.subr.bf16.mxu1 %v1219_v31 }
  0x54   :  { %1006 = vmatprep.subr.bf16.mxu0 %v1219_v31 }
  0x56   :  { %987 = vmatpush3.bf16.msra.mxu1 %v1326_v47 }
  0x57   :  { %1008 = vmatpush3.bf16.msra.mxu0 %v1320_v44  ;;  %988 = vmatprep.subr.bf16.mxu1 %v1219_v31 }
  0x58   :  { %1009 = vmatprep.subr.bf16.mxu0 %v1219_v31 }
  0x5a   :  { %990 = vmatpush3.bf16.msra.mxu1 %v1337_v50 }
  0x5b   :  { %1011 = vmatpush3.bf16.msra.mxu0 %v1326_v47  ;;  %991 = vmatprep.subr.bf16.mxu1 %v1219_v31 }
  0x5c   :  { %1012 = vmatprep.subr.bf16.mxu0 %v1219_v31 }
  0x5e   :  { %993 = vmatpush3.bf16.msra.mxu1 %v1343_v53 }
  0x5f   :  { %1014 = vmatpush3.bf16.msra.mxu0 %v1337_v50  ;;  %994 = vmatprep.subr.bf16.mxu1 %v1219_v31 }
  0x60   :  { %1015 = vmatprep.subr.bf16.mxu0 %v1219_v31 }
  0x62   :  { %996 = vmatpush3.bf16.msra.mxu1 %v1347_v56 }
  0x63   :  { %1017 = vmatpush3.bf16.msra.mxu0 %v1343_v53  ;;  %1021 = vmatprep.subr.bf16.mxu1 %v1219_v31 }
  0x64   :  { %1018 = vmatprep.subr.bf16.mxu0 %v1219_v31 }
  0x67   :  { %1020 = vmatpush3.bf16.msra.mxu0 %v1347_v56 }
  0x68   :  { %1045 = vmatprep.subr.bf16.mxu0 %v1219_v31 }
 0x115   :  { %v178_v1 = vpop.f32.mrb[0].mxu0 }
 0x116   :  { %v179_v2 = vadd.f32 %v178_v1, %v86_v62  ;;  %v180_v3 = vpop.f32.mrb[1].mxu0 }
 0x117   :  { %v181_v4 = vadd.f32 %v180_v3, %v90_v63 }
 0x118   :  { %1089 = vtanh.f32 %v179_v2  ;;  %v249_v5 = vpop.f32.mrb[0].mxu1 }
 0x119   :  { %1091 = vtanh.f32 %v181_v4  ;;  %v251_v6 = vpop.f32.mrb[1].mxu1  ;;  %v1223_v4 = vmov 2  }
 0x11a   :  { %v252_v15 = vadd.f32 %v251_v6, %v98_v13 }
 0x11d   :  { %v320_v7 = vpop.f32.mrb[2].mxu0 }
 0x11e   :  { %v810_v8 = vpop.f32.mrb[3].mxu0  ;;  %v321_v20 = vadd.f32 %v320_v7, %v102_v19 }
 0x120   :  { %v324_v21 = vmul.f32 0.5, %v321_v20 }
 0x122   :  { %v1090_v9 = vpop.eup %1089 }
 0x123   :  { %v1092_v10 = vpop.eup %1091  ;;  %844 = vmatmul.mubr.f32.vlgmr.msra.gmra.mrb[2].mxu1 %v1090_v9 }
 0x124   :  { %1023 = vmatpush3.bf16.msra.mxu1 %v1296_v34  ;;  %879 = vmatmul.mubr.f32.vlgmr.msra.gmra.mrb[4].mxu0 %v1092_v10 }
 0x125   :  { %1047 = vmatpush3.bf16.msra.mxu0 %v1296_v34  ;;  %1024 = vmatprep.subr.bf16.mxu1 %v1219_v31 }
 0x126   :  { %1048 = vmatprep.subr.bf16.mxu0 %v1219_v31  ;;  %913 = vmatprep.mubr.msk.f32.mxu1 %vm1220_vm1, %v1218_v0 }
 0x127   :  { %948 = vmatprep.mubr.msk.f32.mxu0 %vm1220_vm1, %v1218_v0  ;;  %v94_v0 = vrot.slane %v1361_v60, %v93_v11 }
 0x128   :  { %1026 = vmatpush3.bf16.msra.mxu1 %v1304_v38 }
 0x129   :  { %1050 = vmatpush3.bf16.msra.mxu0 %v1304_v38  ;;  %1027 = vmatprep.subr.bf16.mxu1 %v1219_v31  ;;  %v250_v14 = vadd.f32 %v249_v5, %v94_v0  ;;  %v1224_v5 = vmov 3  }
 0x12a   :  { %1051 = vmatprep.subr.bf16.mxu0 %v1219_v31 }
 0x12b   :  { %1093 = vtanh.f32 %v250_v14 }
 0x12c   :  { %1029 = vmatpush3.bf16.msra.mxu1 %v1312_v41  ;;  %1095 = vtanh.f32 %v252_v15 }
 0x12d   :  { %1053 = vmatpush3.bf16.msra.mxu0 %v1312_v41  ;;  %1030 = vmatprep.subr.bf16.mxu1 %v1219_v31  ;;  %1097 = vtanh.f32 %v324_v21 }
 0x12e   :  { %1054 = vmatprep.subr.bf16.mxu0 %v1219_v31 }
 0x130   :  { %1032 = vmatpush3.bf16.msra.mxu1 %v1320_v44 }
 0x131   :  { %1056 = vmatpush3.bf16.msra.mxu0 %v1320_v44  ;;  %1033 = vmatprep.subr.bf16.mxu1 %v1219_v31 }
 0x132   :  { %1057 = vmatprep.subr.bf16.mxu0 %v1219_v31 }
 0x134   :  { %1035 = vmatpush3.bf16.msra.mxu1 %v1326_v47 }
 0x135   :  { %1059 = vmatpush3.bf16.msra.mxu0 %v1326_v47  ;;  %1036 = vmatprep.subr.bf16.mxu1 %v1219_v31  ;;  %v1094_v16 = vpop.eup %1093 }
 0x136   :  { %1060 = vmatprep.subr.bf16.mxu0 %v1219_v31  ;;  %v1096_v17 = vpop.eup %1095 }
 0x137   :  { %v1098_v23 = vpop.eup %1097 }
 0x138   :  { %1038 = vmatpush3.bf16.msra.mxu1 %v1337_v50  ;;  %v326_v29 = vadd.f32 1.0, %v1098_v23 }
 0x139   :  { %1062 = vmatpush3.bf16.msra.mxu0 %v1337_v50  ;;  %1039 = vmatprep.subr.bf16.mxu1 %v1219_v31  ;;  %v1221_v50 = vmov 0  }
 0x13a   :  { %1063 = vmatprep.subr.bf16.mxu0 %v1219_v31  ;;  %1084 = vset.pattern.permute.xlu1 %v1221_v50 }
 0x13c   :  { %1041 = vmatpush3.bf16.msra.mxu1 %v1343_v53 }
 0x13d   :  { %1065 = vmatpush3.bf16.msra.mxu0 %v1343_v53  ;;  %1042 = vmatprep.subr.bf16.mxu1 %v1219_v31 }
 0x13e   :  { %1066 = vmatprep.subr.bf16.mxu0 %v1219_v31  ;;  %v327_v31 = vmul.f32 0.5, %v326_v29 }
 0x140   :  { %1044 = vmatpush3.bf16.msra.mxu1 %v1347_v56  ;;  %v329_v32 = vsel %vm328_vm2, %v327_v31, 0.0 }
 0x141   :  { %1068 = vmatpush3.bf16.msra.mxu0 %v1347_v56 }
 0x143   :  { %914 = vmatmul.mubr.f32.vlgmr.msra.gmra.mrb[4].mxu1 %v1094_v16 }
 0x144   :  { %949 = vmatmul.mubr.f32.vlgmr.msra.gmra.mrb[6].mxu0 %v1096_v17 }
 0x1f6   :  { %v428_v24 = vpop.f32.mrb[2].mxu1 }
 0x1f7   :  { %v429_v25 = vadd.f32 %v726_v22, %v428_v24  ;;  %v845_v26 = vpop.f32.mrb[3].mxu1  ;;  %v514_v27 = vpop.f32.mrb[4].mxu0 }
 0x1f8   :  { %v880_v28 = vpop.f32.mrb[5].mxu0  ;;  %v515_v30 = vadd.f32 %v726_v22, %v514_v27 }
 0x1f9   :  { %432 = vmax.xlane.f32.xlu0 %v429_v25 }
 0x1fd   :  { %518 = vmax.xlane.f32.xlu0 %v515_v30 }
 0x201   :  { %330 = vadd.xlane.f32.xlu0 %v329_v32 }
 0x216   :  { %v600_v33 = vpop.f32.mrb[4].mxu1 }
 0x217   :  { %v601_v34 = vadd.f32 %v726_v22, %v600_v33  ;;  %v915_v35 = vpop.f32.mrb[5].mxu1  ;;  %v686_v36 = vpop.f32.mrb[6].mxu0 }
 0x218   :  { %v950_v37 = vpop.f32.mrb[7].mxu0  ;;  %v687_v38 = vadd.f32 %v726_v22, %v686_v36 }
 0x219   :  { %604 = vmax.xlane.f32.xlu1 %v601_v34 }
 0x21d   :  { %690 = vmax.xlane.f32.xlu1 %v687_v38 }
 0x286   :  { %v433_v39 = vpop.xlane.xlu0 %432 }
 0x287   :  { %v434_v40 = vsub.f32 %v429_v25, %v433_v39 }
 0x289   :  { %v435_v41 = vmul.f32 1.442695, %v434_v40 }
 0x28a   :  { %v519_v42 = vpop.xlane.xlu0 %518 }
 0x28b   :  { %1099 = vpow2.f32 %v435_v41  ;;  %v520_v43 = vsub.f32 %v515_v30, %v519_v42 }
 0x28d   :  { %v521_v44 = vmul.f32 1.442695, %v520_v43 }
 0x28e   :  { %v331_v57 = vpop.xlane.xlu0 %330 }
 0x28f   :  { %1101 = vpow2.f32 %v521_v44  ;;  %v332_v58 = vadd.f32 1e-08, %v331_v57 }
 0x295   :  { %v1100_v45 = vpop.eup %1099 }
 0x296   :  { %437 = vadd.xlane.f32.xlu1 %v1100_v45 }
 0x299   :  { %v1102_v46 = vpop.eup %1101 }
 0x29a   :  { %523 = vadd.xlane.f32.xlu0 %v1102_v46 }
 0x2a6   :  { %v605_v47 = vpop.xlane.xlu1 %604 }
 0x2a7   :  { %v606_v48 = vsub.f32 %v601_v34, %v605_v47 }
 0x2a9   :  { %v607_v49 = vmul.f32 1.442695, %v606_v48 }
 0x2aa   :  { %v691_v51 = vpop.xlane.xlu1 %690 }
 0x2ab   :  { %1103 = vpow2.f32 %v607_v49  ;;  %v692_v52 = vsub.f32 %v687_v38, %v691_v51 }
 0x2ad   :  { %v693_v53 = vmul.f32 1.442695, %v692_v52 }
 0x2af   :  { %1105 = vpow2.f32 %v693_v53 }
 0x2b0   :  { %1107 = vrcp.f32 %v332_v58 }
 0x2b5   :  { %v1104_v55 = vpop.eup %1103 }
 0x2b6   :  { %609 = vadd.xlane.f32.xlu1 %v1104_v55 }
 0x2b9   :  { %v1106_v56 = vpop.eup %1105 }
 0x2ba   :  { %695 = vadd.xlane.f32.xlu0 %v1106_v56  ;;  %v1108_v61 = vpop.eup %1107 }
 0x2bb   :  { %v334_v62 = vmul.f32 %v1108_v61, %v327_v31 }
 0x323   :  { %v438_v59 = vpop.xlane.xlu1 %437 }
 0x324   :  { %1109 = vrcp.f32 %v438_v59 }
 0x327   :  { %v524_v60 = vpop.xlane.xlu0 %523 }
 0x328   :  { %1111 = vrcp.f32 %v524_v60 }
 0x32e   :  { %v1110_v63 = vpop.eup %1109 }
 0x32f   :  { %v440_v1 = vmul.f32 %v1110_v63, %v334_v62 }
 0x331   :  { %443 = vperm.xlu1 %1084, %v440_v1  }
 0x332   :  { %v1112_v2 = vpop.eup %1111 }
 0x333   :  { %v526_v3 = vmul.f32 %v1112_v2, %v334_v62 }
 0x335   :  { %529 = vperm.xlu0 %1085, %v526_v3   ;;  %1086 = vset.pattern.permute.xlu1 %v1223_v4 }
 0x339   :  { %1088 = vset.pattern.permute.xlu0 %v1224_v5 }
 0x343   :  { %v610_v6 = vpop.xlane.xlu1 %609 }
 0x344   :  { %1113 = vrcp.f32 %v610_v6 }
 0x347   :  { %v696_v7 = vpop.xlane.xlu0 %695 }
 0x348   :  { %1115 = vrcp.f32 %v696_v7 }
 0x34e   :  { %v1114_v8 = vpop.eup %1113 }
 0x34f   :  { %v612_v9 = vmul.f32 %v1114_v8, %v334_v62 }
 0x351   :  { %615 = vperm.xlu1 %1086, %v612_v9  }
 0x352   :  { %v1116_v10 = vpop.eup %1115 }
 0x353   :  { %v698_v11 = vmul.f32 %v1116_v10, %v334_v62 }
 0x355   :  { %1087 = vset.pattern.permute.xlu1 %v1224_v5 }
 0x356   :  { %701 = vperm.xlu1 %1087, %v698_v11  }
 0x3b0   :  { %v444_v12 = vpop.permute.xlu1 %443 }
 0x3b1   :  { %v446_v15 = vmul.f32 %v1100_v45, %v444_v12 }
 0x3b4   :  { %v530_v0 = vpop.permute.xlu0 %529 }
 0x3b5   :  { %v532_v13 = vmul.f32 %v1102_v46, %v530_v0 }
 0x3b7   :  { %v533_v17 = vadd.f32 %v532_v13, %v446_v15 }
 0x3d0   :  { %v616_v14 = vpop.permute.xlu1 %615 }
 0x3d1   :  { %v618_v16 = vmul.f32 %v1104_v55, %v616_v14 }
 0x3d3   :  { %v619_v19 = vadd.f32 %v618_v16, %v533_v17 }
 0x3d5   :  { %v702_v18 = vpop.permute.xlu1 %701 }
 0x3d6   :  { %v704_v20 = vmul.f32 %v1106_v56, %v702_v18 }
 0x3d8   :  { %v705_v21 = vadd.f32 %v704_v20, %v619_v19 }
 0x3da   :  { %706 = vst [vmem:[#allocation8] sm:$0xff] %v705_v21 }
 0x3db   :  { %1194 = shalt.err (!%p1191_p0)
}
 0x3dc   :  { %s1195_s12 = scalar_lea.hbm %s1426_s5, 128 }
 0x3dd   :  { %p1196_p1 = scmp.ne.s32.totalorder %s1426_s5, %s1195_s12  ;;  %p1199_p2 = scmp.lt.u32.totalorder %s1195_s12, %s1426_s5 }
 0x3df   :  { %p1201_p3 = pnand %p1199_p2, %p1196_p1 }
 0x3e1   :  { %1204 = shalt.err (!%p1201_p3)
}
 0x3e2   :  { %716 = dma.vmem_to_hbm [thread:$0]  %s714_s8, 128, %s1426_s5, [#allocation4]  }
 0x3e3   :  { %1209 = dma.done.wait [#allocation4], 128  }
 0x3e4   :  { %1210 = vsyncadd [#allocation4], 4294967168 }
 0x3e5   :  { %720 = vsyncpa [#allocation3], 1 }
 0x3e6   :  { %721 = vsyncpa [#allocation6], 1 }
 0x3e7   :  { %722 = vsyncpa [#allocation4], 1 }

</bundles_post_ra>
